<compile_context>
chip_gen: v6e
topology: v6e:2x2x1
jax: 0.10.0
libtpu: 0.0.40
codegen_flags: <defaults>
</compile_context>

<pallas_src>
import functools

import jax
import jax.numpy as jnp
from jax.experimental import pallas as pl
from jax.experimental.pallas import tpu as pltpu


def _dipm_kernel(x1_ref, x2_ref, w1_ref, b1_ref, w2_ref, b2_ref, out_ref,
                 im1_ref, im2_ref, *, H, W, C):
    """Fused DIPM forward for one batch image, channel-major (C, H*W) layout."""
    HW = H * W

    x1 = x1_ref[...].astype(jnp.float32)          # (C, HW)
    x2 = x2_ref[...].astype(jnp.float32)          # (C, HW)

    # sigmoid(x1) * x2 : exp on the EUP, approximate reciprocal also on the EUP.
    a = x2 * pl.reciprocal(1.0 + jnp.exp(-x1), approx=True)

    # Channel concat folded into the im2col K dimension; nothing touches HBM.
    cat = jnp.concatenate([a, x2], axis=0).astype(jnp.bfloat16)   # (2C, HW) bf16

    # Column index of every flattened pixel (lane-axis iota, fully static).
    xcol = jax.lax.broadcasted_iota(jnp.int32, (1, HW), 1) % W

    def build_im2col(ref, src, rows):
        # For a 3x3/pad-1 conv, tap (dy, dx) needs in[y+dy-1, x+dx-1] with zeros outside
        # the image.  In the flattened HW axis that is a static shift by
        # delta = (dy-1)*W + (dx-1).  Zeroing source column W-1 (resp. 0) before the
        # shift is exactly equivalent to masking the invalid left (resp. right)
        # destination column, and the top/bottom rows fall off the [0, HW) range and are
        # zero-filled explicitly.
        srcs = {
            0: jnp.where(xcol != (W - 1), src, jnp.zeros_like(src)),  # taps with dx=0
            1: src,                                                   # taps with dx=1
            2: jnp.where(xcol != 0, src, jnp.zeros_like(src)),        # taps with dx=2
        }
        for dy in range(3):
            for dx in range(3):
                r0 = (dy * 3 + dx) * rows
                s = srcs[dx]
                delta = (dy - 1) * W + (dx - 1)
                if delta >= 0:
                    n = HW - delta
                    ref[r0:r0 + rows, 0:n] = s[:, delta:HW]
                    if delta > 0:
                        ref[r0:r0 + rows, n:HW] = jnp.zeros((rows, delta), ref.dtype)
                else:
                    n = HW + delta
                    ref[r0:r0 + rows, -delta:HW] = s[:, 0:n]
                    ref[r0:r0 + rows, 0:-delta] = jnp.zeros((rows, -delta), ref.dtype)

    # ---- conv1: ONE (C, 9*2C) x (9*2C, HW) MXU matmul, bias + LeakyReLU(0.2) ----
    build_im2col(im1_ref, cat, 2 * C)
    y1 = jnp.dot(w1_ref[...], im1_ref[...], preferred_element_type=jnp.float32)
    y1 = y1 + b1_ref[...]                              # (C, 1) lane-broadcast, f32
    y1 = jnp.where(y1 >= 0, y1, 0.2 * y1)              # LeakyReLU(0.2)

    # ---- conv2: ONE (C, 9*C) x (9*C, HW) MXU matmul, bias, no activation ----
    build_im2col(im2_ref, y1.astype(jnp.bfloat16), C)
    y2 = jnp.dot(w2_ref[...], im2_ref[...], preferred_element_type=jnp.float32)
    y2 = y2 + b2_ref[...]

    out_ref[...] = y2.astype(out_ref.dtype)            # (C, HW) dense lane store


def dipm_pallas_cmajor(x1, x2, w1_flat, b1, w2_flat, b2, *, H, W):
    """Fused DIPM on channel-major inputs.

    x1, x2: (N, C, H*W); w1_flat: (C, 9*2C) bf16; w2_flat: (C, 9*C) bf16; b*: (C, 1) f32.
    Returns (N, C, H*W) in the input dtype.
    """
    N, C, HW = x1.shape
    assert HW == H * W
    assert x2.shape == (N, C, HW)
    assert w1_flat.shape == (C, 9 * 2 * C) and w2_flat.shape == (C, 9 * C)

    kernel = functools.partial(_dipm_kernel, H=H, W=W, C=C)
    img_spec = pl.BlockSpec((pl.Squeezed(), C, HW), lambda n: (n, 0, 0))

    return pl.pallas_call(
        kernel,
        out_shape=jax.ShapeDtypeStruct((N, C, HW), x1.dtype),
        grid_spec=pltpu.PrefetchScalarGridSpec(
            num_scalar_prefetch=0,
            grid=(N,),
            in_specs=[
                img_spec,                                            # x1
                img_spec,                                            # x2
                pl.BlockSpec((C, 9 * 2 * C), lambda n: (0, 0)),      # w1 flat
                pl.BlockSpec((C, 1), lambda n: (0, 0)),              # b1
                pl.BlockSpec((C, 9 * C), lambda n: (0, 0)),          # w2 flat
                pl.BlockSpec((C, 1), lambda n: (0, 0)),              # b2
            ],
            out_specs=pl.BlockSpec((pl.Squeezed(), C, HW), lambda n: (n, 0, 0)),
            scratch_shapes=[
                pltpu.VMEM((9 * 2 * C, HW), jnp.bfloat16),   # conv1 im2col (144, HW)
                pltpu.VMEM((9 * C, HW), jnp.bfloat16),       # conv2 im2col (72, HW)
            ],
        ),
        compiler_params=pltpu.CompilerParams(
            dimension_semantics=("parallel",)),
    )(x1, x2, w1_flat, b1, w2_flat, b2)


def init_dipm_params(key, channel):
    """Deterministic synthetic parameters (weights stored f32 HWIO)."""
    keys = jax.random.split(key, 4)

    def winit(k, shape):
        fan_in = shape[0] * shape[1] * shape[2]
        return jax.random.normal(k, shape, jnp.float32) / jnp.sqrt(fan_in)

    c = channel
    return {
        "w1": winit(keys[0], (3, 3, 2 * c, c)),
        "b1": 0.01 * jax.random.normal(keys[1], (c,), jnp.float32),
        "w2": winit(keys[2], (3, 3, c, c)),
        "b2": 0.01 * jax.random.normal(keys[3], (c,), jnp.float32),
    }


@jax.jit
def dipm_forward(params, x1_nchw, x2_nchw):
    """DIPM.forward(x1, x2): x1, x2 (N, C, H, W) -> (N, C, H, W).

    Only free reshapes at the boundary (kernel is NCHW-native); weights are flattened
    to (C_out, 9*C_in) with K ordered (dy, dx, c_in) to match the in-kernel im2col.
    Passing bf16 x1/x2 is supported and halves HBM traffic.
    """
    N, C, H, W = x1_nchw.shape
    x1 = x1_nchw.reshape(N, C, H * W)
    x2 = x2_nchw.reshape(N, C, H * W)

    w1f = (jnp.transpose(params["w1"], (3, 0, 1, 2))
           .reshape(C, 9 * 2 * C).astype(jnp.bfloat16))
    w2f = (jnp.transpose(params["w2"], (3, 0, 1, 2))
           .reshape(C, 9 * C).astype(jnp.bfloat16))
    b1 = params["b1"].reshape(C, 1).astype(jnp.float32)
    b2 = params["b2"].reshape(C, 1).astype(jnp.float32)

    y = dipm_pallas_cmajor(x1, x2, w1f, b1, w2f, b2, H=H, W=W)
    return y.reshape(N, C, H, W)


# ---------------- pure-JAX f32 reference for correctness checking ----------------
def _conv_ref(x, w, b, leaky):
    y = jax.lax.conv_general_dilated(
        x, w, (1, 1), [(1, 1), (1, 1)],
        dimension_numbers=("NHWC", "HWIO", "NHWC"))
    y = y + b
    if leaky:
        y = jnp.where(y >= 0, y, 0.2 * y)
    return y


def dipm_ref(params, x1_nchw, x2_nchw):
    x1 = jnp.transpose(x1_nchw, (0, 2, 3, 1))
    x2 = jnp.transpose(x2_nchw, (0, 2, 3, 1))
    a = jax.nn.sigmoid(x1) * x2
    xc = jnp.concatenate([a, x2], axis=-1)
    y1 = _conv_ref(xc, params["w1"], params["b1"], leaky=True)
    y2 = _conv_ref(y1, params["w2"], params["b2"], leaky=False)
    return jnp.transpose(y2, (0, 3, 1, 2))


if __name__ == "__main__":
    channel = 8
    N, H, W = 2, 16, 16
    key = jax.random.PRNGKey(0)
    kp, k1, k2 = jax.random.split(key, 3)

    params = init_dipm_params(kp, channel)
    x1 = jax.random.normal(k1, (N, channel, H, W), jnp.float32)   # NCHW
    x2 = jax.random.normal(k2, (N, channel, H, W), jnp.float32)   # NCHW

    out = jax.block_until_ready(dipm_forward(params, x1, x2))
    assert out.shape == (N, channel, H, W), out.shape

    ref = dipm_ref(params, x1, x2)
    err = float(jnp.max(jnp.abs(out - ref)))
    # bf16 MXU operands with f32 accumulation -> expected max |err| ~ 1e-2;
    # structural bugs (shift direction, weight layout) would show up as O(1) errors.
    assert err < 5e-2, f"max abs error vs f32 reference: {err}"

    print("KERNEL_OK")
</pallas_src>

<mosaic_0001>
module attributes {stable_mosaic.version = 11 : i64} {
  func.func @_dipm_kernel(%arg0: i32, %arg1: memref<1x8x256xf32, #tpu.memory_space<vmem>>, %arg2: memref<1x8x256xf32, #tpu.memory_space<vmem>>, %arg3: memref<8x144xbf16, #tpu.memory_space<vmem>>, %arg4: memref<8x1xf32, #tpu.memory_space<vmem>>, %arg5: memref<8x72xbf16, #tpu.memory_space<vmem>>, %arg6: memref<8x1xf32, #tpu.memory_space<vmem>>, %arg7: memref<1x8x256xf32, #tpu.memory_space<vmem>>, %arg8: memref<144x256xbf16, #tpu.memory_space<vmem>>, %arg9: memref<72x256xbf16, #tpu.memory_space<vmem>>) attributes {dimension_semantics = [#tpu.dimension_semantics<parallel>], iteration_bounds = array<i64: 2>, scalar_prefetch = 0 : i64, scratch_operands = 2 : i64, tpu.core_type = #tpu.core_type<tc>, window_params = [{transform_indices = @transform_0, window_bounds = array<i64: 1, 8, 256>}, {transform_indices = @transform_1, window_bounds = array<i64: 1, 8, 256>}, {pipeline_mode = #tpu.pipeline_mode<synchronous>, transform_indices = @transform_2, window_bounds = array<i64: 8, 144>}, {pipeline_mode = #tpu.pipeline_mode<synchronous>, transform_indices = @transform_3, window_bounds = array<i64: 8, 1>}, {pipeline_mode = #tpu.pipeline_mode<synchronous>, transform_indices = @transform_4, window_bounds = array<i64: 8, 72>}, {pipeline_mode = #tpu.pipeline_mode<synchronous>, transform_indices = @transform_5, window_bounds = array<i64: 8, 1>}, {transform_indices = @transform_6, window_bounds = array<i64: 1, 8, 256>}]} {
    %c0 = arith.constant 0 : index
    %c0_0 = arith.constant 0 : index
    %c0_1 = arith.constant 0 : index
    %0 = vector.load %arg1[%c0, %c0_0, %c0_1] : memref<1x8x256xf32, #tpu.memory_space<vmem>>, vector<1x8x256xf32>
    %1 = vector.shape_cast %0 : vector<1x8x256xf32> to vector<8x256xf32>
    %c0_2 = arith.constant 0 : index
    %c0_3 = arith.constant 0 : index
    %c0_4 = arith.constant 0 : index
    %2 = vector.load %arg2[%c0_2, %c0_3, %c0_4] : memref<1x8x256xf32, #tpu.memory_space<vmem>>, vector<1x8x256xf32>
    %3 = vector.shape_cast %2 : vector<1x8x256xf32> to vector<8x256xf32>
    %cst = arith.constant 0.000000e+00 : f32
    %4 = vector.broadcast %cst : f32 to vector<8x256xf32>
    %5 = arith.subf %4, %1 : vector<8x256xf32>
    %6 = math.exp %5 : vector<8x256xf32>
    %cst_5 = arith.constant 1.000000e+00 : f32
    %7 = vector.broadcast %cst_5 : f32 to vector<8x256xf32>
    %8 = arith.addf %7, %6 : vector<8x256xf32>
    %9 = tpu.reciprocal %8 {approx = true} : vector<8x256xf32> -> vector<8x256xf32>
    %10 = arith.mulf %3, %9 : vector<8x256xf32>
    %11 = tpu.concatenate %10, %3 in 0 : vector<8x256xf32>, vector<8x256xf32> -> vector<16x256xf32>
    %12 = arith.truncf %11 : vector<16x256xf32> to vector<16x256xbf16>
    %13 = tpu.iota {dimensions = array<i32: 1>} : vector<1x256xi32>
    %c16_i32 = arith.constant 16 : i32
    %c0_i32 = arith.constant 0 : i32
    %14 = arith.cmpi eq, %c16_i32, %c0_i32 : i32
    %c1_i32 = arith.constant 1 : i32
    %15 = arith.select %14, %c1_i32, %c16_i32 : i32
    %16 = vector.broadcast %15 : i32 to vector<1x256xi32>
    %17 = arith.remsi %13, %16 : vector<1x256xi32>
    %c0_i32_6 = arith.constant 0 : i32
    %18 = vector.broadcast %c0_i32_6 : i32 to vector<1x256xi32>
    %19 = arith.cmpi ne, %17, %18 : vector<1x256xi32>
    %c0_i32_7 = arith.constant 0 : i32
    %20 = vector.broadcast %c0_i32_7 : i32 to vector<1x256xi32>
    %21 = arith.cmpi slt, %17, %20 : vector<1x256xi32>
    %c0_i32_8 = arith.constant 0 : i32
    %22 = arith.cmpi slt, %15, %c0_i32_8 : i32
    %23 = vector.broadcast %22 : i1 to vector<1x256xi1>
    %24 = vector.broadcast %23 : vector<1x256xi1> to vector<1x256xi1>
    %25 = arith.xori %21, %24 : vector<1x256xi1>
    %26 = arith.andi %25, %19 : vector<1x256xi1>
    %27 = vector.broadcast %15 : i32 to vector<1x256xi32>
    %28 = arith.addi %17, %27 : vector<1x256xi32>
    %29 = arith.select %26, %28, %17 : vector<1x256xi1>, vector<1x256xi32>
    %c15_i32 = arith.constant 15 : i32
    %30 = vector.broadcast %c15_i32 : i32 to vector<1x256xi32>
    %31 = arith.cmpi ne, %29, %30 : vector<1x256xi32>
    %cst_9 = arith.constant 0.000000e+00 : bf16
    %32 = vector.broadcast %cst_9 : bf16 to vector<16x256xbf16>
    %33 = vector.shape_cast %31 : vector<1x256xi1> to vector<1x256xi1>
    %34 = vector.broadcast %33 : vector<1x256xi1> to vector<16x256xi1>
    %35 = arith.select %34, %12, %32 : vector<16x256xi1>, vector<16x256xbf16>
    %c0_i32_10 = arith.constant 0 : i32
    %36 = vector.broadcast %c0_i32_10 : i32 to vector<1x256xi32>
    %37 = arith.cmpi ne, %29, %36 : vector<1x256xi32>
    %cst_11 = arith.constant 0.000000e+00 : bf16
    %38 = vector.broadcast %cst_11 : bf16 to vector<16x256xbf16>
    %39 = vector.shape_cast %37 : vector<1x256xi1> to vector<1x256xi1>
    %40 = vector.broadcast %39 : vector<1x256xi1> to vector<16x256xi1>
    %41 = arith.select %40, %12, %38 : vector<16x256xi1>, vector<16x256xbf16>
    %42 = vector.extract_strided_slice %35 {offsets = [0, 0], sizes = [16, 239], strides = [1, 1]} : vector<16x256xbf16> to vector<16x239xbf16>
    %c0_12 = arith.constant 0 : index
    %c17 = arith.constant 17 : index
    %43 = vector.load %arg8[%c0_12, %c17] : memref<144x256xbf16, #tpu.memory_space<vmem>>, vector<16x239xbf16>
    tpu.vector_store %arg8[%c0_12, %c17], %42 {strides = array<i32>} : memref<144x256xbf16, #tpu.memory_space<vmem>>, vector<16x239xbf16>,
    %cst_13 = arith.constant 0.000000e+00 : bf16
    %44 = vector.broadcast %cst_13 : bf16 to vector<16x17xbf16>
    %c0_14 = arith.constant 0 : index
    %c0_15 = arith.constant 0 : index
    %45 = vector.load %arg8[%c0_14, %c0_15] : memref<144x256xbf16, #tpu.memory_space<vmem>>, vector<16x17xbf16>
    tpu.vector_store %arg8[%c0_14, %c0_15], %44 {strides = array<i32>} : memref<144x256xbf16, #tpu.memory_space<vmem>>, vector<16x17xbf16>,
    %46 = vector.extract_strided_slice %12 {offsets = [0, 0], sizes = [16, 240], strides = [1, 1]} : vector<16x256xbf16> to vector<16x240xbf16>
    %c16 = arith.constant 16 : index
    %c16_16 = arith.constant 16 : index
    %47 = vector.load %arg8[%c16, %c16_16] : memref<144x256xbf16, #tpu.memory_space<vmem>>, vector<16x240xbf16>
    tpu.vector_store %arg8[%c16, %c16_16], %46 {strides = array<i32>} : memref<144x256xbf16, #tpu.memory_space<vmem>>, vector<16x240xbf16>,
    %cst_17 = arith.constant 0.000000e+00 : bf16
    %48 = vector.broadcast %cst_17 : bf16 to vector<16x16xbf16>
    %c16_18 = arith.constant 16 : index
    %c0_19 = arith.constant 0 : index
    %49 = vector.load %arg8[%c16_18, %c0_19] : memref<144x256xbf16, #tpu.memory_space<vmem>>, vector<16x16xbf16>
    tpu.vector_store %arg8[%c16_18, %c0_19], %48 {strides = array<i32>} : memref<144x256xbf16, #tpu.memory_space<vmem>>, vector<16x16xbf16>,
    %50 = vector.extract_strided_slice %41 {offsets = [0, 0], sizes = [16, 241], strides = [1, 1]} : vector<16x256xbf16> to vector<16x241xbf16>
    %c32 = arith.constant 32 : index
    %c15 = arith.constant 15 : index
    %51 = vector.load %arg8[%c32, %c15] : memref<144x256xbf16, #tpu.memory_space<vmem>>, vector<16x241xbf16>
    tpu.vector_store %arg8[%c32, %c15], %50 {strides = array<i32>} : memref<144x256xbf16, #tpu.memory_space<vmem>>, vector<16x241xbf16>,
    %cst_20 = arith.constant 0.000000e+00 : bf16
    %52 = vector.broadcast %cst_20 : bf16 to vector<16x15xbf16>
    %c32_21 = arith.constant 32 : index
    %c0_22 = arith.constant 0 : index
    %53 = vector.load %arg8[%c32_21, %c0_22] : memref<144x256xbf16, #tpu.memory_space<vmem>>, vector<16x15xbf16>
    tpu.vector_store %arg8[%c32_21, %c0_22], %52 {strides = array<i32>} : memref<144x256xbf16, #tpu.memory_space<vmem>>, vector<16x15xbf16>,
    %54 = vector.extract_strided_slice %35 {offsets = [0, 0], sizes = [16, 255], strides = [1, 1]} : vector<16x256xbf16> to vector<16x255xbf16>
    %c48 = arith.constant 48 : index
    %c1 = arith.constant 1 : index
    %55 = vector.load %arg8[%c48, %c1] : memref<144x256xbf16, #tpu.memory_space<vmem>>, vector<16x255xbf16>
    tpu.vector_store %arg8[%c48, %c1], %54 {strides = array<i32>} : memref<144x256xbf16, #tpu.memory_space<vmem>>, vector<16x255xbf16>,
    %cst_23 = arith.constant 0.000000e+00 : bf16
    %56 = vector.broadcast %cst_23 : bf16 to vector<16x1xbf16>
    %c48_24 = arith.constant 48 : index
    %c0_25 = arith.constant 0 : index
    %57 = vector.load %arg8[%c48_24, %c0_25] : memref<144x256xbf16, #tpu.memory_space<vmem>>, vector<16x1xbf16>
    tpu.vector_store %arg8[%c48_24, %c0_25], %56 {strides = array<i32>} : memref<144x256xbf16, #tpu.memory_space<vmem>>, vector<16x1xbf16>,
    %c64 = arith.constant 64 : index
    %c0_26 = arith.constant 0 : index
    %58 = vector.load %arg8[%c64, %c0_26] : memref<144x256xbf16, #tpu.memory_space<vmem>>, vector<16x256xbf16>
    tpu.vector_store %arg8[%c64, %c0_26], %12 {strides = array<i32>} : memref<144x256xbf16, #tpu.memory_space<vmem>>, vector<16x256xbf16>,
    %59 = vector.extract_strided_slice %41 {offsets = [0, 1], sizes = [16, 255], strides = [1, 1]} : vector<16x256xbf16> to vector<16x255xbf16>
    %c80 = arith.constant 80 : index
    %c0_27 = arith.constant 0 : index
    %60 = vector.load %arg8[%c80, %c0_27] : memref<144x256xbf16, #tpu.memory_space<vmem>>, vector<16x255xbf16>
    tpu.vector_store %arg8[%c80, %c0_27], %59 {strides = array<i32>} : memref<144x256xbf16, #tpu.memory_space<vmem>>, vector<16x255xbf16>,
    %cst_28 = arith.constant 0.000000e+00 : bf16
    %61 = vector.broadcast %cst_28 : bf16 to vector<16x1xbf16>
    %c80_29 = arith.constant 80 : index
    %c255 = arith.constant 255 : index
    %62 = vector.load %arg8[%c80_29, %c255] : memref<144x256xbf16, #tpu.memory_space<vmem>>, vector<16x1xbf16>
    tpu.vector_store %arg8[%c80_29, %c255], %61 {strides = array<i32>} : memref<144x256xbf16, #tpu.memory_space<vmem>>, vector<16x1xbf16>,
    %63 = vector.extract_strided_slice %35 {offsets = [0, 15], sizes = [16, 241], strides = [1, 1]} : vector<16x256xbf16> to vector<16x241xbf16>
    %c96 = arith.constant 96 : index
    %c0_30 = arith.constant 0 : index
    %64 = vector.load %arg8[%c96, %c0_30] : memref<144x256xbf16, #tpu.memory_space<vmem>>, vector<16x241xbf16>
    tpu.vector_store %arg8[%c96, %c0_30], %63 {strides = array<i32>} : memref<144x256xbf16, #tpu.memory_space<vmem>>, vector<16x241xbf16>,
    %cst_31 = arith.constant 0.000000e+00 : bf16
    %65 = vector.broadcast %cst_31 : bf16 to vector<16x15xbf16>
    %c96_32 = arith.constant 96 : index
    %c241 = arith.constant 241 : index
    %66 = vector.load %arg8[%c96_32, %c241] : memref<144x256xbf16, #tpu.memory_space<vmem>>, vector<16x15xbf16>
    tpu.vector_store %arg8[%c96_32, %c241], %65 {strides = array<i32>} : memref<144x256xbf16, #tpu.memory_space<vmem>>, vector<16x15xbf16>,
    %67 = vector.extract_strided_slice %12 {offsets = [0, 16], sizes = [16, 240], strides = [1, 1]} : vector<16x256xbf16> to vector<16x240xbf16>
    %c112 = arith.constant 112 : index
    %c0_33 = arith.constant 0 : index
    %68 = vector.load %arg8[%c112, %c0_33] : memref<144x256xbf16, #tpu.memory_space<vmem>>, vector<16x240xbf16>
    tpu.vector_store %arg8[%c112, %c0_33], %67 {strides = array<i32>} : memref<144x256xbf16, #tpu.memory_space<vmem>>, vector<16x240xbf16>,
    %cst_34 = arith.constant 0.000000e+00 : bf16
    %69 = vector.broadcast %cst_34 : bf16 to vector<16x16xbf16>
    %c112_35 = arith.constant 112 : index
    %c240 = arith.constant 240 : index
    %70 = vector.load %arg8[%c112_35, %c240] : memref<144x256xbf16, #tpu.memory_space<vmem>>, vector<16x16xbf16>
    tpu.vector_store %arg8[%c112_35, %c240], %69 {strides = array<i32>} : memref<144x256xbf16, #tpu.memory_space<vmem>>, vector<16x16xbf16>,
    %71 = vector.extract_strided_slice %41 {offsets = [0, 17], sizes = [16, 239], strides = [1, 1]} : vector<16x256xbf16> to vector<16x239xbf16>
    %c128 = arith.constant 128 : index
    %c0_36 = arith.constant 0 : index
    %72 = vector.load %arg8[%c128, %c0_36] : memref<144x256xbf16, #tpu.memory_space<vmem>>, vector<16x239xbf16>
    tpu.vector_store %arg8[%c128, %c0_36], %71 {strides = array<i32>} : memref<144x256xbf16, #tpu.memory_space<vmem>>, vector<16x239xbf16>,
    %cst_37 = arith.constant 0.000000e+00 : bf16
    %73 = vector.broadcast %cst_37 : bf16 to vector<16x17xbf16>
    %c128_38 = arith.constant 128 : index
    %c239 = arith.constant 239 : index
    %74 = vector.load %arg8[%c128_38, %c239] : memref<144x256xbf16, #tpu.memory_space<vmem>>, vector<16x17xbf16>
    tpu.vector_store %arg8[%c128_38, %c239], %73 {strides = array<i32>} : memref<144x256xbf16, #tpu.memory_space<vmem>>, vector<16x17xbf16>,
    %c0_39 = arith.constant 0 : index
    %c0_40 = arith.constant 0 : index
    %75 = vector.load %arg3[%c0_39, %c0_40] : memref<8x144xbf16, #tpu.memory_space<vmem>>, vector<8x144xbf16>
    %c0_41 = arith.constant 0 : index
    %c0_42 = arith.constant 0 : index
    %76 = vector.load %arg8[%c0_41, %c0_42] : memref<144x256xbf16, #tpu.memory_space<vmem>>, vector<144x256xbf16>
    %cst_43 = arith.constant dense<0.000000e+00> : vector<8x256xf32>
    %77 = tpu.matmul %75, %76, %cst_43 {dimension_numbers = #tpu.dot_dimension_numbers<[1], [0], [0], [1], [0, 0, 1, 1], [], []>} : vector<8x144xbf16>, vector<144x256xbf16>, vector<8x256xf32> -> vector<8x256xf32>
    %c0_44 = arith.constant 0 : index
    %c0_45 = arith.constant 0 : index
    %78 = vector.load %arg4[%c0_44, %c0_45] : memref<8x1xf32, #tpu.memory_space<vmem>>, vector<8x1xf32>
    %79 = vector.broadcast %78 : vector<8x1xf32> to vector<8x256xf32>
    %80 = arith.addf %77, %79 : vector<8x256xf32>
    %cst_46 = arith.constant 0.000000e+00 : f32
    %81 = vector.broadcast %cst_46 : f32 to vector<8x256xf32>
    %82 = arith.cmpf oge, %80, %81 : vector<8x256xf32>
    %cst_47 = arith.constant 2.000000e-01 : f32
    %83 = vector.broadcast %cst_47 : f32 to vector<8x256xf32>
    %84 = arith.mulf %83, %80 : vector<8x256xf32>
    %85 = arith.select %82, %80, %84 : vector<8x256xi1>, vector<8x256xf32>
    %86 = arith.truncf %85 : vector<8x256xf32> to vector<8x256xbf16>
    %c15_i32_48 = arith.constant 15 : i32
    %87 = vector.broadcast %c15_i32_48 : i32 to vector<1x256xi32>
    %88 = arith.cmpi ne, %29, %87 : vector<1x256xi32>
    %cst_49 = arith.constant 0.000000e+00 : bf16
    %89 = vector.broadcast %cst_49 : bf16 to vector<8x256xbf16>
    %90 = vector.shape_cast %88 : vector<1x256xi1> to vector<1x256xi1>
    %91 = vector.broadcast %90 : vector<1x256xi1> to vector<8x256xi1>
    %92 = arith.select %91, %86, %89 : vector<8x256xi1>, vector<8x256xbf16>
    %c0_i32_50 = arith.constant 0 : i32
    %93 = vector.broadcast %c0_i32_50 : i32 to vector<1x256xi32>
    %94 = arith.cmpi ne, %29, %93 : vector<1x256xi32>
    %cst_51 = arith.constant 0.000000e+00 : bf16
    %95 = vector.broadcast %cst_51 : bf16 to vector<8x256xbf16>
    %96 = vector.shape_cast %94 : vector<1x256xi1> to vector<1x256xi1>
    %97 = vector.broadcast %96 : vector<1x256xi1> to vector<8x256xi1>
    %98 = arith.select %97, %86, %95 : vector<8x256xi1>, vector<8x256xbf16>
    %99 = vector.extract_strided_slice %92 {offsets = [0, 0], sizes = [8, 239], strides = [1, 1]} : vector<8x256xbf16> to vector<8x239xbf16>
    %c0_52 = arith.constant 0 : index
    %c17_53 = arith.constant 17 : index
    %100 = vector.load %arg9[%c0_52, %c17_53] : memref<72x256xbf16, #tpu.memory_space<vmem>>, vector<8x239xbf16>
    tpu.vector_store %arg9[%c0_52, %c17_53], %99 {strides = array<i32>} : memref<72x256xbf16, #tpu.memory_space<vmem>>, vector<8x239xbf16>,
    %cst_54 = arith.constant 0.000000e+00 : bf16
    %101 = vector.broadcast %cst_54 : bf16 to vector<8x17xbf16>
    %c0_55 = arith.constant 0 : index
    %c0_56 = arith.constant 0 : index
    %102 = vector.load %arg9[%c0_55, %c0_56] : memref<72x256xbf16, #tpu.memory_space<vmem>>, vector<8x17xbf16>
    tpu.vector_store %arg9[%c0_55, %c0_56], %101 {strides = array<i32>} : memref<72x256xbf16, #tpu.memory_space<vmem>>, vector<8x17xbf16>,
    %103 = vector.extract_strided_slice %86 {offsets = [0, 0], sizes = [8, 240], strides = [1, 1]} : vector<8x256xbf16> to vector<8x240xbf16>
    %c8 = arith.constant 8 : index
    %c16_57 = arith.constant 16 : index
    %104 = vector.load %arg9[%c8, %c16_57] : memref<72x256xbf16, #tpu.memory_space<vmem>>, vector<8x240xbf16>
    tpu.vector_store %arg9[%c8, %c16_57], %103 {strides = array<i32>} : memref<72x256xbf16, #tpu.memory_space<vmem>>, vector<8x240xbf16>,
    %cst_58 = arith.constant 0.000000e+00 : bf16
    %105 = vector.broadcast %cst_58 : bf16 to vector<8x16xbf16>
    %c8_59 = arith.constant 8 : index
    %c0_60 = arith.constant 0 : index
    %106 = vector.load %arg9[%c8_59, %c0_60] : memref<72x256xbf16, #tpu.memory_space<vmem>>, vector<8x16xbf16>
    tpu.vector_store %arg9[%c8_59, %c0_60], %105 {strides = array<i32>} : memref<72x256xbf16, #tpu.memory_space<vmem>>, vector<8x16xbf16>,
    %107 = vector.extract_strided_slice %98 {offsets = [0, 0], sizes = [8, 241], strides = [1, 1]} : vector<8x256xbf16> to vector<8x241xbf16>
    %c16_61 = arith.constant 16 : index
    %c15_62 = arith.constant 15 : index
    %108 = vector.load %arg9[%c16_61, %c15_62] : memref<72x256xbf16, #tpu.memory_space<vmem>>, vector<8x241xbf16>
    tpu.vector_store %arg9[%c16_61, %c15_62], %107 {strides = array<i32>} : memref<72x256xbf16, #tpu.memory_space<vmem>>, vector<8x241xbf16>,
    %cst_63 = arith.constant 0.000000e+00 : bf16
    %109 = vector.broadcast %cst_63 : bf16 to vector<8x15xbf16>
    %c16_64 = arith.constant 16 : index
    %c0_65 = arith.constant 0 : index
    %110 = vector.load %arg9[%c16_64, %c0_65] : memref<72x256xbf16, #tpu.memory_space<vmem>>, vector<8x15xbf16>
    tpu.vector_store %arg9[%c16_64, %c0_65], %109 {strides = array<i32>} : memref<72x256xbf16, #tpu.memory_space<vmem>>, vector<8x15xbf16>,
    %111 = vector.extract_strided_slice %92 {offsets = [0, 0], sizes = [8, 255], strides = [1, 1]} : vector<8x256xbf16> to vector<8x255xbf16>
    %c24 = arith.constant 24 : index
    %c1_66 = arith.constant 1 : index
    %112 = vector.load %arg9[%c24, %c1_66] : memref<72x256xbf16, #tpu.memory_space<vmem>>, vector<8x255xbf16>
    tpu.vector_store %arg9[%c24, %c1_66], %111 {strides = array<i32>} : memref<72x256xbf16, #tpu.memory_space<vmem>>, vector<8x255xbf16>,
    %cst_67 = arith.constant 0.000000e+00 : bf16
    %113 = vector.broadcast %cst_67 : bf16 to vector<8x1xbf16>
    %c24_68 = arith.constant 24 : index
    %c0_69 = arith.constant 0 : index
    %114 = vector.load %arg9[%c24_68, %c0_69] : memref<72x256xbf16, #tpu.memory_space<vmem>>, vector<8x1xbf16>
    tpu.vector_store %arg9[%c24_68, %c0_69], %113 {strides = array<i32>} : memref<72x256xbf16, #tpu.memory_space<vmem>>, vector<8x1xbf16>,
    %c32_70 = arith.constant 32 : index
    %c0_71 = arith.constant 0 : index
    %115 = vector.load %arg9[%c32_70, %c0_71] : memref<72x256xbf16, #tpu.memory_space<vmem>>, vector<8x256xbf16>
    tpu.vector_store %arg9[%c32_70, %c0_71], %86 {strides = array<i32>} : memref<72x256xbf16, #tpu.memory_space<vmem>>, vector<8x256xbf16>,
    %116 = vector.extract_strided_slice %98 {offsets = [0, 1], sizes = [8, 255], strides = [1, 1]} : vector<8x256xbf16> to vector<8x255xbf16>
    %c40 = arith.constant 40 : index
    %c0_72 = arith.constant 0 : index
    %117 = vector.load %arg9[%c40, %c0_72] : memref<72x256xbf16, #tpu.memory_space<vmem>>, vector<8x255xbf16>
    tpu.vector_store %arg9[%c40, %c0_72], %116 {strides = array<i32>} : memref<72x256xbf16, #tpu.memory_space<vmem>>, vector<8x255xbf16>,
    %cst_73 = arith.constant 0.000000e+00 : bf16
    %118 = vector.broadcast %cst_73 : bf16 to vector<8x1xbf16>
    %c40_74 = arith.constant 40 : index
    %c255_75 = arith.constant 255 : index
    %119 = vector.load %arg9[%c40_74, %c255_75] : memref<72x256xbf16, #tpu.memory_space<vmem>>, vector<8x1xbf16>
    tpu.vector_store %arg9[%c40_74, %c255_75], %118 {strides = array<i32>} : memref<72x256xbf16, #tpu.memory_space<vmem>>, vector<8x1xbf16>,
    %120 = vector.extract_strided_slice %92 {offsets = [0, 15], sizes = [8, 241], strides = [1, 1]} : vector<8x256xbf16> to vector<8x241xbf16>
    %c48_76 = arith.constant 48 : index
    %c0_77 = arith.constant 0 : index
    %121 = vector.load %arg9[%c48_76, %c0_77] : memref<72x256xbf16, #tpu.memory_space<vmem>>, vector<8x241xbf16>
    tpu.vector_store %arg9[%c48_76, %c0_77], %120 {strides = array<i32>} : memref<72x256xbf16, #tpu.memory_space<vmem>>, vector<8x241xbf16>,
    %cst_78 = arith.constant 0.000000e+00 : bf16
    %122 = vector.broadcast %cst_78 : bf16 to vector<8x15xbf16>
    %c48_79 = arith.constant 48 : index
    %c241_80 = arith.constant 241 : index
    %123 = vector.load %arg9[%c48_79, %c241_80] : memref<72x256xbf16, #tpu.memory_space<vmem>>, vector<8x15xbf16>
    tpu.vector_store %arg9[%c48_79, %c241_80], %122 {strides = array<i32>} : memref<72x256xbf16, #tpu.memory_space<vmem>>, vector<8x15xbf16>,
    %124 = vector.extract_strided_slice %86 {offsets = [0, 16], sizes = [8, 240], strides = [1, 1]} : vector<8x256xbf16> to vector<8x240xbf16>
    %c56 = arith.constant 56 : index
    %c0_81 = arith.constant 0 : index
    %125 = vector.load %arg9[%c56, %c0_81] : memref<72x256xbf16, #tpu.memory_space<vmem>>, vector<8x240xbf16>
    tpu.vector_store %arg9[%c56, %c0_81], %124 {strides = array<i32>} : memref<72x256xbf16, #tpu.memory_space<vmem>>, vector<8x240xbf16>,
    %cst_82 = arith.constant 0.000000e+00 : bf16
    %126 = vector.broadcast %cst_82 : bf16 to vector<8x16xbf16>
    %c56_83 = arith.constant 56 : index
    %c240_84 = arith.constant 240 : index
    %127 = vector.load %arg9[%c56_83, %c240_84] : memref<72x256xbf16, #tpu.memory_space<vmem>>, vector<8x16xbf16>
    tpu.vector_store %arg9[%c56_83, %c240_84], %126 {strides = array<i32>} : memref<72x256xbf16, #tpu.memory_space<vmem>>, vector<8x16xbf16>,
    %128 = vector.extract_strided_slice %98 {offsets = [0, 17], sizes = [8, 239], strides = [1, 1]} : vector<8x256xbf16> to vector<8x239xbf16>
    %c64_85 = arith.constant 64 : index
    %c0_86 = arith.constant 0 : index
    %129 = vector.load %arg9[%c64_85, %c0_86] : memref<72x256xbf16, #tpu.memory_space<vmem>>, vector<8x239xbf16>
    tpu.vector_store %arg9[%c64_85, %c0_86], %128 {strides = array<i32>} : memref<72x256xbf16, #tpu.memory_space<vmem>>, vector<8x239xbf16>,
    %cst_87 = arith.constant 0.000000e+00 : bf16
    %130 = vector.broadcast %cst_87 : bf16 to vector<8x17xbf16>
    %c64_88 = arith.constant 64 : index
    %c239_89 = arith.constant 239 : index
    %131 = vector.load %arg9[%c64_88, %c239_89] : memref<72x256xbf16, #tpu.memory_space<vmem>>, vector<8x17xbf16>
    tpu.vector_store %arg9[%c64_88, %c239_89], %130 {strides = array<i32>} : memref<72x256xbf16, #tpu.memory_space<vmem>>, vector<8x17xbf16>,
    %c0_90 = arith.constant 0 : index
    %c0_91 = arith.constant 0 : index
    %132 = vector.load %arg5[%c0_90, %c0_91] : memref<8x72xbf16, #tpu.memory_space<vmem>>, vector<8x72xbf16>
    %c0_92 = arith.constant 0 : index
    %c0_93 = arith.constant 0 : index
    %133 = vector.load %arg9[%c0_92, %c0_93] : memref<72x256xbf16, #tpu.memory_space<vmem>>, vector<72x256xbf16>
    %cst_94 = arith.constant dense<0.000000e+00> : vector<8x256xf32>
    %134 = tpu.matmul %132, %133, %cst_94 {dimension_numbers = #tpu.dot_dimension_numbers<[1], [0], [0], [1], [0, 0, 1, 1], [], []>} : vector<8x72xbf16>, vector<72x256xbf16>, vector<8x256xf32> -> vector<8x256xf32>
    %c0_95 = arith.constant 0 : index
    %c0_96 = arith.constant 0 : index
    %135 = vector.load %arg6[%c0_95, %c0_96] : memref<8x1xf32, #tpu.memory_space<vmem>>, vector<8x1xf32>
    %136 = vector.broadcast %135 : vector<8x1xf32> to vector<8x256xf32>
    %137 = arith.addf %134, %136 : vector<8x256xf32>
    %c0_97 = arith.constant 0 : index
    %c0_98 = arith.constant 0 : index
    %c0_99 = arith.constant 0 : index
    %138 = vector.load %arg7[%c0_97, %c0_98, %c0_99] : memref<1x8x256xf32, #tpu.memory_space<vmem>>, vector<1x8x256xf32>
    %139 = vector.shape_cast %138 : vector<1x8x256xf32> to vector<8x256xf32>
    %140 = vector.shape_cast %137 : vector<8x256xf32> to vector<1x8x256xf32>
    tpu.vector_store %arg7[%c0_97, %c0_98, %c0_99], %140 {strides = array<i32>} : memref<1x8x256xf32, #tpu.memory_space<vmem>>, vector<1x8x256xf32>,
    return
  }
  func.func @transform_0(%arg0: i32) -> (i32, i32, i32) {
    %c0_i32 = arith.constant 0 : i32
    %c0_i32_0 = arith.constant 0 : i32
    %c0_i32_1 = arith.constant 0 : i32
    return %arg0, %c0_i32, %c0_i32_0 : i32, i32, i32
  }
  func.func @transform_1(%arg0: i32) -> (i32, i32, i32) {
    %c0_i32 = arith.constant 0 : i32
    %c0_i32_0 = arith.constant 0 : i32
    %c0_i32_1 = arith.constant 0 : i32
    return %arg0, %c0_i32, %c0_i32_0 : i32, i32, i32
  }
  func.func @transform_2(%arg0: i32) -> (i32, i32) {
    %c0_i32 = arith.constant 0 : i32
    %c0_i32_0 = arith.constant 0 : i32
    %c0_i32_1 = arith.constant 0 : i32
    return %c0_i32, %c0_i32_0 : i32, i32
  }
  func.func @transform_3(%arg0: i32) -> (i32, i32) {
    %c0_i32 = arith.constant 0 : i32
    %c0_i32_0 = arith.constant 0 : i32
    %c0_i32_1 = arith.constant 0 : i32
    return %c0_i32, %c0_i32_0 : i32, i32
  }
  func.func @transform_4(%arg0: i32) -> (i32, i32) {
    %c0_i32 = arith.constant 0 : i32
    %c0_i32_0 = arith.constant 0 : i32
    %c0_i32_1 = arith.constant 0 : i32
    return %c0_i32, %c0_i32_0 : i32, i32
  }
  func.func @transform_5(%arg0: i32) -> (i32, i32) {
    %c0_i32 = arith.constant 0 : i32
    %c0_i32_0 = arith.constant 0 : i32
    %c0_i32_1 = arith.constant 0 : i32
    return %c0_i32, %c0_i32_0 : i32, i32
  }
  func.func @transform_6(%arg0: i32) -> (i32, i32, i32) {
    %c0_i32 = arith.constant 0 : i32
    %c0_i32_0 = arith.constant 0 : i32
    %c0_i32_1 = arith.constant 0 : i32
    return %arg0, %c0_i32, %c0_i32_0 : i32, i32, i32
  }
}

</mosaic_0001>

<bundles_post_ra>
// kernel: dipm_forward.1
= control target key start
LH: loop header
LB: loop body
LE: loop exit
PB: predicated region body
PF: predicated region fallthrough
CT: control target
= control target key end

     0   :  { %s1143_s21 = smov 0   ;;  %s1425_s0 = inlined_call_operand.vmem [shape: f32[2,8,256], index: 0, kind: input, shape index: {}]   ;;  %s1426_s1 = inlined_call_operand.vmem [shape: f32[2,8,256], index: 1, kind: input, shape index: {}]   ;;  %s1427_s2 = inlined_call_operand.vmem [shape: bf16[8,144], index: 2, kind: input, shape index: {}]   ;;  %s1428_s3 = inlined_call_operand.vmem [shape: f32[8,1], index: 3, kind: input, shape index: {}]   ;;  %s1429_s4 = inlined_call_operand.vmem [shape: bf16[8,72], index: 4, kind: input, shape index: {}]   ;;  %s1430_s5 = inlined_call_operand.vmem [shape: f32[8,1], index: 5, kind: input, shape index: {}]   ;;  %s1431_s6 = inlined_call_operand.vmem [shape: f32[2,8,256], index: 6, kind: output, shape index: {}]  }
   0x1 LB: > { %s966_s22 = sadd.s32 4294967295, %s1097_s21   ;;  %p970_p0 = scmp.ge.s32.totalorder %s1097_s21, 1  ;;  %s1097_s21 = sphi %s1143_s21, %s16_s21  }
   0x2   : > { %p222_p1 = scmp.lt.s32.totalorder %s1097_s21, 3 }
   0x4   : > { %p223_p2 = pnand %p970_p0, %p222_p1 }
   0x5   : > { %p257_p3 = scmp.lt.s32.totalorder (!%p223_p2), %s966_s22, 1  ;;  %s1100_s30 = smov (!%p223_p2), 112  }
   0x6   : > { %226 = sbr.rel (%p223_p2) target bundleno = 775 (0x307), region = 44  ;;  %s1101_s7 = smov (!%p223_p2), 113  }
   0x7   : > { %s1102_s8 = smov (!%p223_p2), 127   ;;  %s1103_s9 = smov (!%p223_p2), 1  }
   0x8   : > { %s1104_s10 = smov (!%p223_p2), 15   ;;  %s1105_s11 = smov (!%p223_p2), 16  }
   0x9   : > { %s1106_s12 = smov (!%p223_p2), 17   ;;  %s1107_s13 = smov (!%p223_p2), 111  }
   0xb   : > { %v1099_v0 = vmov 0   ;;  %s1484_s22 = smov (!%p257_p3, %s966_s22), 1  ;;  %v293_v10 = vlaneseq  ;;  %v1216_v43 = vld [vmem:[%s1427_s2] sm:$0xff]  ;;  %vm1446_vm10 = vcmask 130048   ;;  %vm1447_vm11 = vcmask 1043456  }
   0xc   : > { %1044 = vset.pattern.permute.xlu0 %v1099_v0  ;;  %888 = vmatprep.mubr.bf16.mxu1 %v1099_v0  ;;  %s1153_s23 = sshll.u32 %s1484_s22, 4  ;;  %v984_v44 = vcombine.high %v1216_v43, %v1216_v43  ;;  %v553_v45 = vld [vmem:[%s1428_s3] sm:$0xff]  ;;  %vm509_vm12 = vcmask 916484   ;;  %vm1432_vm13 = vcmask 916480   ;;  %vm491_vm15 = vcmask 924676  }
   0xd   : > { %s261_s26 = scalar_lea.vmem %s1425_s0, %s1153_s23  ;;  %s266_s29 = scalar_lea.vmem %s1426_s1, %s1153_s23  ;;  %v294_v11 = vand.u32 127, %v293_v10  ;;  %v329_v19 = vshrl.u32 %v293_v10, 7  ;;  %vm1225_vm14 = vmor %vm509_vm12, %vm1447_vm11 }
   0xe   : > { %v275_v1 = vld [vmem:[%s261_s26] sm:$0xff]  ;;  %v276_v2 = vld [vmem:[%s261_s26 + $0x8] sm:$0xff]  ;;  %1003 = vmatprep.mubr.msk.bf16.mxu0 %vm1446_vm10, %v984_v44  ;;  %s271_s26 = scalar_lea.vmem %s1431_s6, %s1153_s23 }
   0xf   : > { %v277_v3 = vld [vmem:[%s266_s29] sm:$0xff]  ;;  %v278_v4 = vld [vmem:[%s266_s29 + $0x8] sm:$0xff]  ;;  %v279_v5 = vsub.f32 0.0, %v275_v1  ;;  %v280_v6 = vsub.f32 0.0, %v276_v2  ;;  %v295_v12 = vadd.s32 128, %v294_v11  ;;  %v300_v16 = vand.u32 15, %v294_v11 }
  0x10   : > { %v1163_v7 = vpack.c.bf16 %v278_v4, %v277_v3  ;;  %v330_v20 = vsub.s32 0, %v329_v19  ;;  %v334_v22 = vsub.s32 4, %v329_v19 }
  0x11   : > { %v281_v8 = vmul.f32 1.442695, %v279_v5  ;;  %v283_v9 = vmul.f32 1.442695, %v280_v6  ;;  %v307_v17 = vand.u32 15, %v295_v12  ;;  %vm320_vm0 = vcmp.ne.s32.totalorder %v300_v16, 15 }
  0x12   : > { %vm340_vm2 = vcmp.ne.s32.totalorder %v300_v16, 0 }
  0x13   : > { %1081 = vpow2.f32 %v281_v8  ;;  %vm321_vm1 = vcmp.ne.s32.totalorder %v307_v17, 15  ;;  %vm341_vm3 = vcmp.ne.s32.totalorder %v307_v17, 0 }
  0x14   : > { %1083 = vpow2.f32 %v283_v9  ;;  %vm326_vm4 = vmpackc.low %vm321_vm1, %vm320_vm0  ;;  %vm1435_vm0 = vcmask 1044352   ;;  %vm1434_vm1 = vcmask 924672  }
  0x15   : > { %vm346_vm5 = vmpackc.low %vm341_vm3, %vm340_vm2  ;;  %v327_v21 = vsel %vm326_vm4, 65537, %v1099_v0  ;;  %vm1437_vm3 = vcmask 1044360   ;;  %vm473_vm4 = vcmask 1039364  }
  0x16   : > { %v347_v23 = vsel %vm346_vm5, 65537, %v1099_v0  ;;  %v1167_v24 = vrot.slane %v327_v21, %v330_v20  ;;  %v1169_v25 = vrot.slane %v327_v21, %v334_v22  ;;  %vm1233_vm2 = vmor %vm491_vm15, %vm1447_vm11  ;;  %vm1439_vm5 = vcmask 1039360  }
  0x17   : > { %v1171_v27 = vrot.slane %v347_v23, %v330_v20  ;;  %v1173_v28 = vrot.slane %v347_v23, %v334_v22  ;;  %vm1250_vm12 = vmor %vm473_vm4, %vm1447_vm11  ;;  %vm1438_vm15 = vcmask 1044472   ;;  %vm1440_vm4 = vcmask 7168  }
  0x18   : > { %vm1433_vm6 = vcmp.ne.s16.totalorder %v1167_v24, 0  ;;  %vm1436_vm7 = vcmp.ne.s16.totalorder %v1169_v25, 0 }
  0x19   : > { %vm356_vm8 = vcmp.ne.s16.totalorder %v1171_v27, 0  ;;  %vm1444_vm9 = vcmp.ne.s16.totalorder %v1173_v28, 0  ;;  %v795_v27 = vld [vmem:[%s1430_s5] sm:$0xff] }
  0x20   : > { %v1082_v13 = vpop.eup %1081 }
  0x21   : > { %v1084_v14 = vpop.eup %1083  ;;  %v285_v15 = vadd.f32 1.0, %v1082_v13 }
  0x22   : > { %v286_v18 = vadd.f32 1.0, %v1084_v14 }
  0x23   : > { %1085 = vrcp.f32 %v285_v15 }
  0x24   : > { %1087 = vrcp.f32 %v286_v18 }
  0x30   : > { %v1086_v26 = vpop.eup %1085 }
  0x31   : > { %v1088_v29 = vpop.eup %1087  ;;  %v289_v30 = vmul.f32 %v1086_v26, %v277_v3 }
  0x32   : > { %v290_v31 = vmul.f32 %v1088_v29, %v278_v4 }
  0x33   : > { %v1176_v32 = vpack.c.bf16 %v277_v3, %v289_v30 }
  0x34   : > { %v1024_v33 = vpack.c.bf16 %v290_v31, %v289_v30  ;;  %v1179_v34 = vpack.c.bf16 %v278_v4, %v290_v31 }
  0x35   : > { %v338_v35 = vsel %vm1433_vm6, %v1176_v32, 0  ;;  %v358_v38 = vsel %vm356_vm8, %v1176_v32, 0  ;;  %vm450_vm6 = vcmask 1043464  }
  0x36   : > { %498 = vrot.lane.b32.xlu0 %v1024_v33, %s1100_s30  ;;  %v339_v36 = vsel %vm1436_vm7, %v1179_v34, 0  ;;  %v359_v39 = vsel %vm1444_vm9, %v1179_v34, 0  ;;  %vm432_vm7 = vcmask 1043576   ;;  %vm527_vm9 = vcmask 908292  }
  0x37   : > { %v977_v37 = vcombine.low %v338_v35, %v339_v36  ;;  %v978_v40 = vcombine.high %v338_v35, %v339_v36  ;;  %v981_v41 = vcombine.low %v358_v38, %v359_v39  ;;  %v982_v42 = vcombine.high %v358_v38, %v359_v39 }
  0x39   : > { %480 = vrot.lane.b32.xlu1 %v977_v37, %s1101_s7 }
  0x3a   : > { %500 = vrot.lane.b32.xlu0 %v1163_v7, %s1100_s30 }
  0x3d   : > { %482 = vrot.lane.b32.xlu1 %v978_v40, %s1101_s7 }
  0x3e   : > { %461 = vrot.lane.b32.xlu0 %v981_v41, %s1102_s8 }
  0x41   : > { %463 = vrot.lane.b32.xlu1 %v982_v42, %s1102_s8 }
  0x42   : > { %439 = vrot.lane.b32.xlu0 %v977_v37, %s1103_s9 }
  0x45   : > { %441 = vrot.lane.b32.xlu1 %v978_v40, %s1103_s9 }
  0x46   : > { %421 = vrot.lane.b32.xlu0 %v981_v41, %s1104_s10 }
  0x49   : > { %423 = vrot.lane.b32.xlu1 %v982_v42, %s1104_s10 }
  0x4a   : > { %395 = vrot.lane.b32.xlu0 %v1024_v33, %s1105_s11 }
  0x4d   : > { %397 = vrot.lane.b32.xlu1 %v1163_v7, %s1105_s11 }
  0x4e   : > { %368 = vrot.lane.b32.xlu0 %v977_v37, %s1106_s12 }
  0x51   : > { %370 = vrot.lane.b32.xlu1 %v978_v40, %s1106_s12 }
  0x52   : > { %516 = vrot.lane.b32.xlu0 %v981_v41, %s1107_s13 }
  0x55   : > { %518 = vrot.lane.b32.xlu1 %v982_v42, %s1107_s13 }
  0x56   : > { %556 = vperm.xlu0 %1044, %v553_v45  }
  0xa8   : > { %v499_v46 = vpop.permute.xlu0 %498 }
  0xa9   : > { %v502_v48 = vrot.slane %v499_v46, 4 }
  0xab   : > { %v505_v49 = vsel %vm1432_vm13, %v499_v46, %v502_v48  ;;  %v481_v50 = vpop.permute.xlu1 %480 }
  0xac   : > { %511 = vst.msk [vmem:[#allocation2 + $0x70] sm:$0xff] %vm1225_vm14, %v505_v49  ;;  %v484_v52 = vrot.slane %v481_v50, 4  ;;  %v501_v53 = vpop.permute.xlu0 %500 }
  0xad   : > { %514 = vst.msk [vmem:[#allocation2 + $0x74] sm:$0xf] %vm1435_vm0, %v1099_v0  ;;  %v503_v54 = vrot.slane %v501_v53, 4 }
  0xae   : > { %v487_v55 = vsel %vm1434_vm1, %v481_v50, %v484_v52 }
  0xaf   : > { %493 = vst.msk [vmem:[#allocation2 + $0x60] sm:$0xff] %vm1233_vm2, %v487_v55  ;;  %v506_v56 = vsel %vm1432_vm13, %v501_v53, %v503_v54  ;;  %v483_v57 = vpop.permute.xlu1 %482  ;;  %vm380_vm13 = vcmask 1047556  }
  0xb0   : > { %496 = vst.msk [vmem:[#allocation2 + $0x64] sm:$0xf] %vm1437_vm3, %v1099_v0  ;;  %v485_v58 = vrot.slane %v483_v57, 4  ;;  %v462_v59 = vpop.permute.xlu0 %461 }
  0xb1   : > { %512 = vst.msk [vmem:[#allocation2 + $0x78] sm:$0xff] %vm1225_vm14, %v506_v56  ;;  %v465_v61 = vrot.slane %v462_v59, 4 }
  0xb2   : > { %515 = vst.msk [vmem:[#allocation2 + $0x7c] sm:$0xf] %vm1435_vm0, %v1099_v0  ;;  %v488_v62 = vsel %vm1434_vm1, %v483_v57, %v485_v58  ;;  %vm1265_vm1 = vmor %vm380_vm13, %vm450_vm6  ;;  %vm1441_vm0 = vcmask 3072  }
  0xb3   : > { %494 = vst.msk [vmem:[#allocation2 + $0x68] sm:$0xff] %vm1233_vm2, %v488_v62  ;;  %v468_v63 = vsel %vm1439_vm5, %v462_v59, %v465_v61  ;;  %v464_v1 = vpop.permute.xlu1 %463  ;;  %vm1280_vm6 = vmor %vm380_vm13, %vm432_vm7 }
  0xb4   : > { %497 = vst.msk [vmem:[#allocation2 + $0x6c] sm:$0xf] %vm1437_vm3, %v1099_v0  ;;  %v466_v2 = vrot.slane %v464_v1, 4  ;;  %v440_v3 = vpop.permute.xlu0 %439  ;;  %vm1442_vm3 = vcmask 121856  }
  0xb5   : > { %475 = vst.msk [vmem:[#allocation2 + $0x50] sm:$0xff] %vm1250_vm12, %v468_v63  ;;  %v443_v5 = vrot.slane %v440_v3, 4 }
  0xb6   : > { %478 = vst.msk [vmem:[#allocation2 + $0x54] sm:$0xf] %vm1438_vm15, %v1099_v0  ;;  %v469_v6 = vsel %vm1439_vm5, %v464_v1, %v466_v2  ;;  %vm406_vm5 = vcmask 1043584   ;;  %v983_v2 = vcombine.low %v1216_v43, %v1216_v43 }
  0xb7   : > { %476 = vst.msk [vmem:[#allocation2 + $0x58] sm:$0xff] %vm1250_vm12, %v469_v6  ;;  %v446_v7 = vsel %vm1440_vm4, %v443_v5, %v440_v3  ;;  %v442_v8 = vpop.permute.xlu1 %441  ;;  %vm1295_vm7 = vmor %vm380_vm13, %vm406_vm5  ;;  %vm374_vm5 = vcmask 138240  }
  0xb8   : > { %479 = vst.msk [vmem:[#allocation2 + $0x5c] sm:$0xf] %vm1438_vm15, %v1099_v0  ;;  %v444_v9 = vrot.slane %v442_v8, 4  ;;  %v1047_v11 = vld [vmem:[#allocation2 + $0x70] ss:$8 sps:$4 sm:$0xff]   ;;  %v422_v12 = vpop.permute.xlu0 %421  ;;  %vm1443_vm15 = vcmask 117760  }
  0xb9   : > { %452 = vst.msk [vmem:[#allocation2 + $0x30] sm:$0xff] %vm1265_vm1, %v446_v7  ;;  %v1045_v10 = vld [vmem:[#allocation2 + $0x74] ss:$8 sps:$4 sm:$0xff]   ;;  %v425_v14 = vrot.slane %v422_v12, 4 }
  0xba   : > { %455 = vst.msk [vmem:[#allocation2 + $0x30] sm:$0xf] %vm1441_vm0, %v1099_v0  ;;  %v447_v15 = vsel %vm1440_vm4, %v444_v9, %v442_v8  ;;  %659 = vmatprep.subr.bf16.mxu0 %v1045_v10  ;;  %v1050_v21 = vld [vmem:[#allocation2 + $0x60] ss:$8 sps:$4 sm:$0xff]   ;;  %vm1445_vm4 = vcmask 125952  }
  0xbb   : > { %453 = vst.msk [vmem:[#allocation2 + $0x38] sm:$0xff] %vm1265_vm1, %v447_v15  ;;  %660 = vmatpush1.bf16.msra.mxu0 %v1047_v11  ;;  %v428_v16 = vsel %vm1442_vm3, %v425_v14, %v422_v12  ;;  %v424_v17 = vpop.permute.xlu1 %423  ;;  %v1048_v18 = vld [vmem:[#allocation2 + $0x64] ss:$8 sps:$4 sm:$0xff]  }
  0xbc   : > { %456 = vst.msk [vmem:[#allocation2 + $0x38] sm:$0xf] %vm1441_vm0, %v1099_v0  ;;  %v426_v19 = vrot.slane %v424_v17, 4  ;;  %v396_v20 = vpop.permute.xlu0 %395  ;;  %661 = vmatprep.subr.bf16.mxu0 %v1048_v18  ;;  %vm379_vm0 = vcmask 1043592  }
  0xbd   : > { %434 = vst.msk [vmem:[#allocation2 + $0x20] sm:$0xff] %vm1280_vm6, %v428_v16  ;;  %v399_v23 = vrot.slane %v396_v20, 4 }
  0xbe   : > { %437 = vst.msk [vmem:[#allocation2 + $0x20] sm:$0xf] %vm1443_vm15, %v1099_v0  ;;  %v429_v26 = vsel %vm1442_vm3, %v426_v19, %v424_v17  ;;  %v1053_v36 = vld [vmem:[#allocation2 + $0x50] ss:$8 sps:$4 sm:$0xff]   ;;  %vm1310_vm3 = vmor %vm380_vm13, %vm379_vm0  ;;  %vm522_vm13 = vcmask 908288  }
  0xbf   : > { %435 = vst.msk [vmem:[#allocation2 + $0x28] sm:$0xff] %vm1280_vm6, %v429_v26  ;;  %662 = vmatpush1.bf16.msra.mxu0 %v1050_v21  ;;  %v402_v29 = vsel %vm1446_vm10, %v399_v23, %v396_v20  ;;  %v398_v30 = vpop.permute.xlu1 %397  ;;  %v1051_v31 = vld [vmem:[#allocation2 + $0x54] ss:$8 sps:$4 sm:$0xff]   ;;  %vm1326_vm0 = vmor %vm527_vm9, %vm1447_vm11  ;;  %vm1465_vm11 = vcmp.ne.s16.totalorder %v1173_v28, 0 }
  0xc0   : > { %438 = vst.msk [vmem:[#allocation2 + $0x28] sm:$0xf] %vm1443_vm15, %v1099_v0  ;;  %v400_v33 = vrot.slane %v398_v30, 4  ;;  %v369_v35 = vpop.permute.xlu0 %368  ;;  %663 = vmatprep.subr.bf16.mxu0 %v1051_v31  ;;  %vm1448_vm15 = vcmask 134144  }
  0xc1   : > { %408 = vst.msk [vmem:[#allocation2 + $0x10] sm:$0xff] %vm1295_vm7, %v402_v29  ;;  %v372_v38 = vrot.slane %v369_v35, 4  ;;  %v541_v50 = vld [vmem:[#allocation2 + $0x30] sm:$0xff] }
  0xc2   : > { %411 = vst.msk [vmem:[#allocation2 + $0x10] sm:$0xf] %vm1445_vm4, %v1099_v0  ;;  %v403_v39 = vsel %vm1446_vm10, %v400_v33, %v398_v30  ;;  %v1054_v45 = vld [vmem:[#allocation2 + $0x34] ss:$8 sps:$4 sm:$0xff]  }
  0xc3   : > { %409 = vst.msk [vmem:[#allocation2 + $0x18] sm:$0xff] %vm1295_vm7, %v403_v39  ;;  %664 = vmatpush1.bf16.msra.mxu0 %v1053_v36  ;;  %v375_v40 = vsel %vm374_vm5, %v372_v38, %v369_v35  ;;  %v371_v41 = vpop.permute.xlu1 %370  ;;  %v542_v52 = vld [vmem:[#allocation2 + $0x38] sm:$0xff] }
  0xc4   : > { %412 = vst.msk [vmem:[#allocation2 + $0x18] sm:$0xf] %vm1445_vm4, %v1099_v0  ;;  %v373_v42 = vrot.slane %v371_v41, 4  ;;  %665 = vmatprep.subr.bf16.mxu0 %v1179_v34  ;;  %v517_v44 = vpop.permute.xlu0 %516  ;;  %vm531_vm4 = vcmask 1044344   ;;  %v991_v56 = vcombine.low %v541_v50, %v542_v52 }
  0xc5   : > { %382 = vst.msk [vmem:[#allocation2] sm:$0xff] %vm1310_vm3, %v375_v40  ;;  %v520_v48 = vrot.slane %v517_v44, 4 }
  0xc6   : > { %385 = vst.msk [vmem:[#allocation2] sm:$0xf] %vm1448_vm15, %v1099_v0  ;;  %v376_v49 = vsel %vm374_vm5, %v373_v42, %v371_v41  ;;  %v1056_v55 = vld [vmem:[#allocation2 + $0x24] ss:$8 sps:$4 sm:$0xff]  }
  0xc7   : > { %383 = vst.msk [vmem:[#allocation2 + $0x8] sm:$0xff] %vm1310_vm3, %v376_v49  ;;  %666 = vmatpush1.bf16.msra.mxu0 %v1176_v32  ;;  %v523_v34 = vsel %vm522_vm13, %v517_v44, %v520_v48  ;;  %v519_v53 = vpop.permute.xlu1 %518  ;;  %v1058_v58 = vld [vmem:[#allocation2 + $0x20] ss:$8 sps:$4 sm:$0xff]  }
  0xc8   : > { %386 = vst.msk [vmem:[#allocation2 + $0x8] sm:$0xf] %vm1448_vm15, %v1099_v0  ;;  %667 = vmatprep.subr.bf16.mxu0 %v1054_v45  ;;  %v521_v54 = vrot.slane %v519_v53, 4  ;;  %vm1466_vm15 = vcmp.ne.s16.totalorder %v1169_v25, 0 }
  0xc9   : > { %529 = vst.msk [vmem:[#allocation2 + $0x80] sm:$0xff] %vm1326_vm0, %v523_v34 }
  0xca   : > { %532 = vst.msk [vmem:[#allocation2 + $0x84] sm:$0xf] %vm531_vm4, %v1099_v0  ;;  %v524_v57 = vsel %vm522_vm13, %v519_v53, %v521_v54  ;;  %v1059_v32 = vld [vmem:[#allocation2 + $0x14] ss:$8 sps:$4 sm:$0xff]  }
  0xcb   : > { %530 = vst.msk [vmem:[#allocation2 + $0x88] sm:$0xff] %vm1326_vm0, %v524_v57  ;;  %668 = vmatpush1.bf16.msra.mxu0 %v991_v56  ;;  %v1061_v61 = vld [vmem:[#allocation2 + $0x10] ss:$8 sps:$4 sm:$0xff]  }
  0xcc   : > { %533 = vst.msk [vmem:[#allocation2 + $0x8c] sm:$0xf] %vm531_vm4, %v1099_v0  ;;  %669 = vmatprep.subr.bf16.mxu0 %v1056_v55 }
  0xce   : > { %v1062_v59 = vld [vmem:[#allocation2 + $0x4] ss:$8 sps:$4 sm:$0xff]  }
  0xcf   : > { %670 = vmatpush1.bf16.msra.mxu0 %v1058_v58  ;;  %v1064_v63 = vld [vmem:[#allocation2] ss:$8 sps:$4 sm:$0xff]  }
  0xd0   : > { %671 = vmatprep.subr.bf16.mxu0 %v1059_v32 }
  0xd1   : > { %v557_v3 = vpop.permute.xlu0 %556 }
  0xd2   : > { %v1067_v1 = vld [vmem:[#allocation2 + $0x80] ss:$8 sps:$4 sm:$0xff]  }
  0xd3   : > { %672 = vmatpush1.bf16.msra.mxu0 %v1061_v61  ;;  %v1065_v62 = vld [vmem:[#allocation2 + $0x84] ss:$8 sps:$4 sm:$0xff]   ;;  %v785_v61 = vld [vmem:[%s1429_s4] sm:$0xf] }
  0xd4   : > { %673 = vmatprep.subr.bf16.mxu0 %v1062_v59 }
  0xd7   : > { %674 = vmatpush1.bf16.msra.mxu0 %v1064_v63 }
  0xd8   : > { %689 = vmatprep.subr.bf16.mxu0 %v1065_v62 }
  0xdb   : > { %690 = vmatpush2.bf16.msra.mxu0 %v1067_v1 }
  0xde   : > { %692 = vmatmul.mubr.bf16.vlgmr.msra.gmra.mxu0 %v983_v2 }
 0x19e   : > { %v693_v5 = vpop.f32.mrf.mxu0 }
 0x19f   : > { %v694_v6 = vadd.f32 %v693_v5, %v557_v3 }
 0x1a0   : > { %v695_v7 = vpop.f32.mrf.mxu0 }
 0x1a1   : > { %vm700_vm9 = vcmp.ge.f32.partialorder %v694_v6, 0.0  ;;  %v702_v8 = vmul.f32 0.2, %v694_v6  ;;  %v696_v9 = vadd.f32 %v695_v7, %v557_v3 }
 0x1a2   : > { %v697_v10 = vpop.f32.mrf.mxu0 }
 0x1a3   : > { %vm701_vm10 = vcmp.ge.f32.partialorder %v696_v9, 0.0  ;;  %v703_v11 = vmul.f32 0.2, %v696_v9  ;;  %v704_v12 = vsel %vm700_vm9, %v694_v6, %v702_v8  ;;  %vm1472_vm9 = vcmask 924672  }
 0x1a4   : > { %v698_v14 = vpop.f32.mrf.mxu0  ;;  %v706_v15 = vpack.c.bf16 %v704_v12, %v704_v12 }
 0x1a5   : > { %v705_v16 = vsel %vm701_vm10, %v696_v9, %v703_v11  ;;  %vm1467_vm10 = vcmp.ne.s16.totalorder %v1167_v24, 0 }
 0x1a6   : > { %v707_v17 = vpack.c.bf16 %v705_v16, %v705_v16  ;;  %v1348_v18 = vpack.c.bf16 %v705_v16, %v704_v12  ;;  %v710_v43 = vsel %vm356_vm8, %v706_v15, 0  ;;  %v708_v23 = vsel %vm1467_vm10, %v706_v15, 0 }
 0x1a7   : > { %vm1468_vm8 = vcmask 916480   ;;  %vm1481_vm10 = vcmask 130048  }
 0x1a8   : > { %771 = vrot.lane.b32.xlu0 %v1348_v18, %s1100_s30  ;;  %v711_v19 = vsel %vm1465_vm11, %v707_v17, 0  ;;  %v709_v21 = vsel %vm1466_vm15, %v707_v17, 0  ;;  %vm1469_vm11 = vcmask 1044352   ;;  %vm1470_vm15 = vcmask 121856  }
 0x1a9   : > { %v1006_v20 = vcombine.low %v710_v43, %v711_v19  ;;  %v1004_v26 = vcombine.low %v708_v23, %v709_v21 }
 0x1ab   : > { %778 = vrot.lane.b32.xlu1 %v1006_v20, %s1107_s13 }
 0x1ac   : > { %741 = vrot.lane.b32.xlu0 %v1006_v20, %s1104_s10 }
 0x1af   : > { %764 = vrot.lane.b32.xlu1 %v1004_v26, %s1101_s7 }
 0x1b0   : > { %717 = vrot.lane.b32.xlu0 %v1004_v26, %s1106_s12 }
 0x1b3   : > { %757 = vrot.lane.b32.xlu1 %v1006_v20, %s1102_s8 }
 0x1b4   : > { %798 = vperm.xlu0 %1044, %v795_v27  }
 0x1b7   : > { %748 = vrot.lane.b32.xlu1 %v1004_v26, %s1103_s9 }
 0x1bb   : > { %729 = vrot.lane.b32.xlu1 %v1348_v18, %s1105_s11 }
 0x21a   : > { %v772_v25 = vpop.permute.xlu0 %771 }
 0x21b   : > { %v773_v24 = vrot.slane %v772_v25, 4 }
 0x21d   : > { %v774_v28 = vsel %vm1468_vm8, %v772_v25, %v773_v24  ;;  %v779_v29 = vpop.permute.xlu1 %778  ;;  %vm1482_vm8 = vcmask 125952  }
 0x21e   : > { %776 = vst.msk [vmem:[#allocation3 + $0x38] sm:$0xff] %vm1225_vm14, %v774_v28  ;;  %v780_v30 = vrot.slane %v779_v29, 4  ;;  %v742_v31 = vpop.permute.xlu0 %741  ;;  %vm1471_vm14 = vcmask 117760  }
 0x21f   : > { %777 = vst.msk [vmem:[#allocation3 + $0x3c] sm:$0xf] %vm1469_vm11, %v1099_v0  ;;  %v743_v33 = vrot.slane %v742_v31, 4 }
 0x220   : > { %v781_v35 = vsel %vm522_vm13, %v779_v29, %v780_v30  ;;  %vm1473_vm13 = vcmask 1044360  }
 0x221   : > { %783 = vst.msk [vmem:[#allocation3 + $0x40] sm:$0xff] %vm1326_vm0, %v781_v35  ;;  %v744_v36 = vsel %vm1470_vm15, %v743_v33, %v742_v31  ;;  %v765_v38 = vpop.permute.xlu1 %764 }
 0x222   : > { %784 = vst.msk [vmem:[#allocation3 + $0x44] sm:$0xf] %vm531_vm4, %v1099_v0  ;;  %v766_v47 = vrot.slane %v765_v38, 4  ;;  %v718_v39 = vpop.permute.xlu0 %717  ;;  %vm1474_vm4 = vcmask 134144  }
 0x223   : > { %746 = vst.msk [vmem:[#allocation3 + $0x10] sm:$0xff] %vm1280_vm6, %v744_v36  ;;  %v719_v40 = vrot.slane %v718_v39, 4  ;;  %vm1475_vm6 = vcmask 1039360  }
 0x224   : > { %747 = vst.msk [vmem:[#allocation3 + $0x10] sm:$0xf] %vm1471_vm14, %v1099_v0  ;;  %v767_v41 = vsel %vm1472_vm9, %v765_v38, %v766_v47 }
 0x225   : > { %769 = vst.msk [vmem:[#allocation3 + $0x30] sm:$0xff] %vm1233_vm2, %v767_v41  ;;  %v720_v42 = vsel %vm374_vm5, %v719_v40, %v718_v39  ;;  %v758_v44 = vpop.permute.xlu1 %757  ;;  %vm1476_vm2 = vcmask 1044472   ;;  %vm1477_vm5 = vcmask 7168  }
 0x226   : > { %770 = vst.msk [vmem:[#allocation3 + $0x34] sm:$0xf] %vm1473_vm13, %v1099_v0  ;;  %v759_v13 = vrot.slane %v758_v44, 4 }
 0x227   : > { %722 = vst.msk [vmem:[#allocation3] sm:$0xff] %vm1310_vm3, %v720_v42  ;;  %vm1478_vm3 = vcmask 1043456  }
 0x228   : > { %723 = vst.msk [vmem:[#allocation3] sm:$0xf] %vm1474_vm4, %v1099_v0  ;;  %v760_v45 = vsel %vm1475_vm6, %v758_v44, %v759_v13  ;;  %vm1479_vm0 = vmmov %vm1478_vm3 }
 0x229   : > { %762 = vst.msk [vmem:[#allocation3 + $0x28] sm:$0xff] %vm1250_vm12, %v760_v45  ;;  %v749_v51 = vpop.permute.xlu1 %748  ;;  %v794_v46 = vld [vmem:[#allocation3 + $0x40] sm:$0xff]  ;;  %vm1480_vm12 = vcmask 3072  }
 0x22a   : > { %763 = vst.msk [vmem:[#allocation3 + $0x2c] sm:$0xf] %vm1476_vm2, %v1099_v0  ;;  %v750_v48 = vrot.slane %v749_v51, 4  ;;  %v1016_v49 = vcombine.high %v794_v46, %v794_v46  ;;  %v1015_v50 = vcombine.low %v794_v46, %v794_v46 }
 0x22c   : > { %v751_v37 = vsel %vm1477_vm5, %v750_v48, %v749_v51  ;;  %1017 = vmatprep.subr.msk.bf16.mxu1 %vm1478_vm3, %v1016_v49  ;;  %v851_v52 = vsel %vm1479_vm0, %v1015_v50, 0  ;;  %v1074_v54 = vld [vmem:[#allocation3 + $0x30] ss:$8 sps:$4 sm:$0xff]  }
 0x22d   : > { %753 = vst.msk [vmem:[#allocation3 + $0x18] sm:$0xff] %vm1265_vm1, %v751_v37  ;;  %863 = vmatpush1.bf16.msra.mxu1 %v851_v52  ;;  %v730_v60 = vpop.permute.xlu1 %729  ;;  %v1072_v34 = vld [vmem:[#allocation3 + $0x34] ss:$8 sps:$4 sm:$0xff]   ;;  %vm846_vm1 = vcmask 588800  }
 0x22e   : > { %754 = vst.msk [vmem:[#allocation3 + $0x18] sm:$0xf] %vm1480_vm12, %v1099_v0  ;;  %v731_v53 = vrot.slane %v730_v60, 4  ;;  %864 = vmatprep.subr.bf16.mxu1 %v1072_v34 }
 0x230   : > { %v732_v55 = vsel %vm1481_vm10, %v731_v53, %v730_v60 }
 0x231   : > { %734 = vst.msk [vmem:[#allocation3 + $0x8] sm:$0xff] %vm1295_vm7, %v732_v55  ;;  %865 = vmatpush1.bf16.msra.mxu1 %v1074_v54  ;;  %v791_v56 = vld [vmem:[#allocation3 + $0x28] sm:$0xff] }
 0x232   : > { %735 = vst.msk [vmem:[#allocation3 + $0x8] sm:$0xf] %vm1482_vm8, %v1099_v0  ;;  %v1012_v4 = vcombine.high %v1348_v18, %v791_v56  ;;  %v1011_v57 = vcombine.low %v1348_v18, %v791_v56  ;;  %v799_v0 = vpop.permute.xlu0 %798 }
 0x234   : > { %866 = vmatprep.subr.bf16.mxu1 %v1012_v4  ;;  %v1075_v32 = vld [vmem:[#allocation3 + $0x14] ss:$8 sps:$4 sm:$0xff]  }
 0x235   : > { %867 = vmatpush1.bf16.msra.mxu1 %v1011_v57  ;;  %v1077_v58 = vld [vmem:[#allocation3 + $0x10] ss:$8 sps:$4 sm:$0xff]  }
 0x236   : > { %868 = vmatprep.subr.bf16.mxu1 %v1075_v32 }
 0x238   : > { %v1078_v59 = vld [vmem:[#allocation3 + $0x4] ss:$8 sps:$4 sm:$0xff]  }
 0x239   : > { %869 = vmatpush1.bf16.msra.mxu1 %v1077_v58  ;;  %v1080_v22 = vld [vmem:[#allocation3] ss:$8 sps:$4 sm:$0xff]  }
 0x23a   : > { %870 = vmatprep.subr.bf16.mxu1 %v1078_v59 }
 0x23d   : > { %871 = vmatpush1.bf16.msra.mxu1 %v1080_v22 }
 0x240   : > { %1018 = vmatmul.mubr.msk.bf16.vlgmr.msra.gmra.mxu1 %vm846_vm1, %v785_v61 }
 0x300   : > { %v890_v62 = vpop.f32.mrf.mxu1 }
 0x301   : > { %v891_v63 = vadd.f32 %v890_v62, %v799_v0 }
 0x302   : > { %v892_v1 = vpop.f32.mrf.mxu1 }
 0x303   : > { %897 = vst [vmem:[%s271_s26] sm:$0xff] %v891_v63  ;;  %v893_v2 = vadd.f32 %v892_v1, %v799_v0 }
 0x304   : > { %v894_v3 = vpop.f32.mrf.mxu1 }
 0x305   : > { %898 = vst [vmem:[%s271_s26 + $0x8] sm:$0xff] %v893_v2 }
 0x306   : > { %v895_v5 = vpop.f32.mrf.mxu1 }
 0x307 PF: > { %s16_s21 = sadd.s32 1, %s1097_s21  }
 0x308   : > { %p13_p4 = scmp.ge.s32.totalorder %s16_s21, 4  }
 0x30a   :  { %15 = sbr.rel (!%p13_p4) target bundleno = 1 (0x1), region = 77 }

</bundles_post_ra>
